<compile_context>
chip_gen: v7x
topology: tpu7x:2x2x1
jax: 0.10.0
libtpu: 0.0.40
codegen_flags: <defaults>
</compile_context>

<pallas_src>
import functools

import jax
import jax.numpy as jnp
from jax import lax
from jax.experimental import pallas as pl
from jax.experimental.pallas import tpu as pltpu


# ----------------------------------------------------------------------------
# helpers
# ----------------------------------------------------------------------------
def _round_up(n, m):
    return ((n + m - 1) // m) * m


def _cdiv(a, b):
    return -(-a // b)


def _pad_to(a, shape):
    pads = [(0, t - s) for s, t in zip(a.shape, shape)]
    if all(p == (0, 0) for p in pads):
        return a
    return jnp.pad(a, pads)


def _vmem_budget_bytes(headroom=0.80):
    """Generation-aware scoped-VMEM budget (~80% of physical VMEM)."""
    cap = 64 << 20  # conservative fallback (v7x per-TC VMEM)
    try:
        info = pltpu.get_tpu_info()
        cap = int(getattr(info, "vmem_capacity_bytes", cap))
    except Exception:
        pass
    return int(cap * headroom)


# ----------------------------------------------------------------------------
# kernels
# ----------------------------------------------------------------------------
def _ff_kernel_resident(*refs, num_hidden_layers, compute_dtype):
    """All weights resident in VMEM; grid tiles only the batch dim.

    refs (L > 0): x, w1, b1, wh, bh, w3, b3, out
    refs (L == 0): x, w1, b1, w3, b3, out
    """
    if num_hidden_layers > 0:
        x_ref, w1_ref, b1_ref, wh_ref, bh_ref, w3_ref, b3_ref, o_ref = refs
    else:
        x_ref, w1_ref, b1_ref, w3_ref, b3_ref, o_ref = refs
        wh_ref = bh_ref = None

    # fc1 + ReLU (f32 MXU accumulation; bias/ReLU in f32)
    h = jnp.dot(x_ref[...], w1_ref[...], preferred_element_type=jnp.float32)
    h = jnp.maximum(h + b1_ref[...], 0.0)

    def layer(h_in, w_i, b_i):
        y = jnp.dot(h_in.astype(compute_dtype), w_i,
                    preferred_element_type=jnp.float32)
        return jnp.maximum(y + b_i, 0.0)

    if num_hidden_layers > 0:
        if num_hidden_layers <= 8:
            # Static unroll: full scheduler visibility across layer boundaries
            # (layer i+1 weight reads / MXU pushes hide behind layer i epilogue).
            for i in range(num_hidden_layers):
                h = layer(h, wh_ref[i], bh_ref[i])
        else:
            # Deep MLP: bounded live ranges, partially unrolled for visibility.
            h = lax.fori_loop(
                0, num_hidden_layers,
                lambda i, hc: layer(hc, wh_ref[i], bh_ref[i]),
                h, unroll=2)

    out = jnp.dot(h.astype(compute_dtype), w3_ref[...],
                  preferred_element_type=jnp.float32) + b3_ref[...]
    o_ref[...] = out.astype(o_ref.dtype)


def _ff_kernel_streaming(x_ref, w1_ref, b1_ref, whl_ref, bhl_ref, w3_ref,
                         b3_ref, o_ref, h_ref, *, compute_dtype):
    """Streams one hidden layer's weights per grid step (grid = (batch, L)).

    fc1 runs at l == 0, fc3 at l == L-1; the activation is carried across the
    layer axis in the f32 VMEM scratch h_ref.  Hidden weights are
    double-buffered by the default pipeline, so layer l+1's DMA overlaps
    layer l's matmul.
    """
    l = pl.program_id(1)

    @pl.when(l == 0)
    def _():
        h0 = jnp.dot(x_ref[...], w1_ref[...],
                     preferred_element_type=jnp.float32)
        h_ref[...] = jnp.maximum(h0 + b1_ref[...], 0.0)

    # dropout is identity at eval; hidden layer l: linear + ReLU
    y = jnp.dot(h_ref[...].astype(compute_dtype), whl_ref[0],
                preferred_element_type=jnp.float32)
    h_ref[...] = jnp.maximum(y + bhl_ref[0], 0.0)

    @pl.when(l == pl.num_programs(1) - 1)
    def _():
        out = jnp.dot(h_ref[...].astype(compute_dtype), w3_ref[...],
                      preferred_element_type=jnp.float32) + b3_ref[...]
        o_ref[...] = out.astype(o_ref.dtype)


# ----------------------------------------------------------------------------
# wrapper
# ----------------------------------------------------------------------------
def prepare_params(params, *, compute_dtype=jnp.bfloat16, lane_multiple=128):
    """Pad + cast weights once (outside the per-call path).

    Weights are stored as (in_features, out_features) slabs, biases as
    (1, features) lane-dense slabs, all padded to multiples of `lane_multiple`
    (128 by default; 256 is a cheap A/B on v6e/v7x for small widths).
    """
    w1, b1, wh, bh, w3, b3 = params
    compute_dtype = jnp.dtype(compute_dtype)
    input_dim, H = w1.shape
    L = wh.shape[0]
    output_dim = w3.shape[1]

    Kp = _round_up(input_dim, lane_multiple)
    Hp = _round_up(H, lane_multiple)
    Op = _round_up(output_dim, lane_multiple)

    return dict(
        w1=_pad_to(w1, (Kp, Hp)).astype(compute_dtype),
        b1=_pad_to(b1, (1, Hp)).astype(jnp.float32),
        wh=(_pad_to(wh, (L, Hp, Hp)).astype(compute_dtype) if L > 0 else None),
        bh=(_pad_to(bh, (L, 1, Hp)).astype(jnp.float32) if L > 0 else None),
        w3=_pad_to(w3, (Hp, Op)).astype(compute_dtype),
        b3=_pad_to(b3, (1, Op)).astype(jnp.float32),
        dims=(input_dim, L, H, output_dim, Kp, Hp, Op),
        compute_dtype=compute_dtype,
    )


def ff_network_forward(x, prepared, *, batch_tile=None, force_streaming=False):
    """Fused FF_network forward pass (eval mode) via pallas_call."""
    input_dim, L, H, output_dim, Kp, Hp, Op = prepared["dims"]
    compute_dtype = prepared["compute_dtype"]
    is_bf16 = compute_dtype == jnp.dtype(jnp.bfloat16)
    wbytes = compute_dtype.itemsize

    B = x.shape[0]
    assert x.shape[1] == input_dim

    budget = _vmem_budget_bytes()

    # Strategy choice: keep all weights resident when they fit comfortably,
    # otherwise stream the hidden-layer stack one layer at a time.
    resident_w_bytes = ((Kp * Hp + L * Hp * Hp + Hp * Op) * wbytes
                        + (Hp + L * Hp + Op) * 4)
    streaming = (L >= 1) and (force_streaming
                              or resident_w_bytes > 0.4 * budget)
    if streaming:
        # fc1/fc3 resident + two streamed (Hp, Hp) layer buffers.
        w_bytes = ((Kp * Hp + 2 * Hp * Hp + Hp * Op) * wbytes
                   + (Hp + 2 * Hp + Op) * 4)
    else:
        w_bytes = resident_w_bytes

    # bf16 path: bf16 padded output store (halves lane-padded HBM writeback).
    store_dtype = jnp.bfloat16 if is_bf16 else jnp.float32
    obytes = jnp.dtype(store_dtype).itemsize

    # Per-batch-row VMEM (x tile double-buffered, out tile double-buffered,
    # f32 activation + cast copy + f32 out temp).
    per_row = (2 * Kp * wbytes + 2 * Op * obytes
               + 4 * Hp + (4 + wbytes) * Hp + 4 * Op)

    # Batch tile: auto-size from leftover VMEM, amortizing per-step overhead.
    if batch_tile is None:
        avail = max(budget - w_bytes - (6 << 20), 1)
        bt_cap = max(8, (avail // per_row) // 8 * 8)
        target = 1024 if is_bf16 else 512
        bt = min(target, bt_cap)
    else:
        bt = _round_up(batch_tile, 8)
    bt = max(8, min(bt, _round_up(B, 8)))
    # Keep >= 2 batch grid steps when B allows (two TensorCores on v7x).
    if bt >= B and B >= 16:
        bt = _round_up(_cdiv(B, 2), 8)
    Bp = _round_up(B, bt)
    nb = Bp // bt

    xp = _pad_to(x, (Bp, Kp)).astype(compute_dtype)

    need = w_bytes + bt * per_row + (8 << 20)
    vmem_limit = int(min(budget, max(32 << 20, int(need * 1.25))))

    single = pl.Buffered(1)  # constant-index weights: no double buffer

    if not streaming:
        if L > 0:
            in_specs = [
                pl.BlockSpec((bt, Kp), lambda i: (i, 0)),
                pl.BlockSpec((Kp, Hp), lambda i: (0, 0), pipeline_mode=single),
                pl.BlockSpec((1, Hp), lambda i: (0, 0), pipeline_mode=single),
                pl.BlockSpec((L, Hp, Hp), lambda i: (0, 0, 0),
                             pipeline_mode=single),
                pl.BlockSpec((L, 1, Hp), lambda i: (0, 0, 0),
                             pipeline_mode=single),
                pl.BlockSpec((Hp, Op), lambda i: (0, 0), pipeline_mode=single),
                pl.BlockSpec((1, Op), lambda i: (0, 0), pipeline_mode=single),
            ]
            args = (xp, prepared["w1"], prepared["b1"], prepared["wh"],
                    prepared["bh"], prepared["w3"], prepared["b3"])
        else:
            in_specs = [
                pl.BlockSpec((bt, Kp), lambda i: (i, 0)),
                pl.BlockSpec((Kp, Hp), lambda i: (0, 0), pipeline_mode=single),
                pl.BlockSpec((1, Hp), lambda i: (0, 0), pipeline_mode=single),
                pl.BlockSpec((Hp, Op), lambda i: (0, 0), pipeline_mode=single),
                pl.BlockSpec((1, Op), lambda i: (0, 0), pipeline_mode=single),
            ]
            args = (xp, prepared["w1"], prepared["b1"],
                    prepared["w3"], prepared["b3"])

        kernel = functools.partial(_ff_kernel_resident,
                                   num_hidden_layers=L,
                                   compute_dtype=compute_dtype)
        grid = (nb,)
        out_specs = pl.BlockSpec((bt, Op), lambda i: (i, 0))
        scratch_shapes = []
        dim_sem = ("parallel",)
    else:
        in_specs = [
            pl.BlockSpec((bt, Kp), lambda i, l: (i, 0)),
            pl.BlockSpec((Kp, Hp), lambda i, l: (0, 0), pipeline_mode=single),
            pl.BlockSpec((1, Hp), lambda i, l: (0, 0), pipeline_mode=single),
            # streamed per layer; default double-buffering overlaps DMA/MXU
            pl.BlockSpec((1, Hp, Hp), lambda i, l: (l, 0, 0)),
            pl.BlockSpec((1, 1, Hp), lambda i, l: (l, 0, 0)),
            pl.BlockSpec((Hp, Op), lambda i, l: (0, 0), pipeline_mode=single),
            pl.BlockSpec((1, Op), lambda i, l: (0, 0), pipeline_mode=single),
        ]
        args = (xp, prepared["w1"], prepared["b1"], prepared["wh"],
                prepared["bh"], prepared["w3"], prepared["b3"])

        kernel = functools.partial(_ff_kernel_streaming,
                                   compute_dtype=compute_dtype)
        grid = (nb, L)
        out_specs = pl.BlockSpec((bt, Op), lambda i, l: (i, 0))
        scratch_shapes = [pltpu.VMEM((bt, Hp), jnp.float32)]
        dim_sem = ("parallel", "arbitrary")

    out_padded = pl.pallas_call(
        kernel,
        out_shape=jax.ShapeDtypeStruct((Bp, Op), store_dtype),
        grid_spec=pltpu.PrefetchScalarGridSpec(
            num_scalar_prefetch=0,
            grid=grid,
            in_specs=in_specs,
            out_specs=out_specs,
            scratch_shapes=scratch_shapes,
        ),
        compiler_params=pltpu.CompilerParams(
            dimension_semantics=dim_sem,
            vmem_limit_bytes=vmem_limit),
    )(*args)

    out = out_padded[:B, :output_dim]
    return out.astype(jnp.float32)


# ----------------------------------------------------------------------------
# init + reference
# ----------------------------------------------------------------------------
def init_params(key, input_dim, num_hidden_layers, num_units_per_layer,
                output_dim):
    """Deterministic init mimicking nn.Linear's U(-1/sqrt(fan_in), +...)."""
    H = num_units_per_layer
    ks = jax.random.split(key, 6)

    def uni(k, shape, fan_in):
        bound = 1.0 / jnp.sqrt(fan_in)
        return jax.random.uniform(k, shape, jnp.float32, -bound, bound)

    w1 = uni(ks[0], (input_dim, H), input_dim)
    b1 = uni(ks[1], (1, H), input_dim)
    wh = uni(ks[2], (num_hidden_layers, H, H), H)
    bh = uni(ks[3], (num_hidden_layers, 1, H), H)
    w3 = uni(ks[4], (H, output_dim), H)
    b3 = uni(ks[5], (1, output_dim), H)
    return w1, b1, wh, bh, w3, b3


def ff_network_ref(x, params):
    """Pure-JAX reference (eval-mode forward of the PyTorch module)."""
    w1, b1, wh, bh, w3, b3 = params
    h = jnp.maximum(x @ w1 + b1, 0.0)
    for i in range(wh.shape[0]):
        h = jnp.maximum(h @ wh[i] + bh[i], 0.0)
    return h @ w3 + b3


# ----------------------------------------------------------------------------
# main
# ----------------------------------------------------------------------------
if __name__ == "__main__":
    batch = 16
    input_dim = 32
    num_hidden_layers = 2
    num_units_per_layer = 64
    output_dim = 8
    # dropout_p = 0.5  # inactive at evaluation time

    key = jax.random.PRNGKey(0)
    kx, kp = jax.random.split(key)
    x = jax.random.normal(kx, (batch, input_dim), jnp.float32)
    params = init_params(kp, input_dim, num_hidden_layers,
                         num_units_per_layer, output_dim)
    ref = ff_network_ref(x, params)

    # 1) f32 operand path: bit-tight vs. the pure-JAX reference.
    prep_f32 = prepare_params(params, compute_dtype=jnp.float32)
    out_f32 = jax.block_until_ready(ff_network_forward(x, prep_f32))
    assert out_f32.shape == (batch, output_dim)
    assert jnp.allclose(out_f32, ref, atol=1e-4, rtol=1e-4), "f32 mismatch"

    # 2) Default bf16 operand path (f32 accumulation): looser tolerance.
    prep_bf16 = prepare_params(params)  # bf16 default
    out_bf16 = jax.block_until_ready(ff_network_forward(x, prep_bf16))
    assert out_bf16.shape == (batch, output_dim)
    assert jnp.allclose(out_bf16, ref, atol=5e-2, rtol=5e-2), "bf16 mismatch"

    # 3) Layer-streaming path (forced; normally auto-selected for big models).
    out_stream = jax.block_until_ready(
        ff_network_forward(x, prep_bf16, force_streaming=True))
    assert out_stream.shape == (batch, output_dim)
    assert jnp.allclose(out_stream, ref, atol=5e-2, rtol=5e-2), "stream mismatch"

    # 4) L == 0 edge case (no hidden-layer slabs passed at all).
    params0 = init_params(kp, input_dim, 0, num_units_per_layer, output_dim)
    ref0 = ff_network_ref(x, params0)
    prep0 = prepare_params(params0, compute_dtype=jnp.float32)
    out0 = jax.block_until_ready(ff_network_forward(x, prep0))
    assert jnp.allclose(out0, ref0, atol=1e-4, rtol=1e-4), "L=0 mismatch"

    print("KERNEL_OK")
</pallas_src>

<mosaic_0001>
module attributes {stable_mosaic.version = 11 : i64} {
  func.func @_ff_kernel_resident(%arg0: i32, %arg1: memref<8x128xf32, #tpu.memory_space<vmem>>, %arg2: memref<128x128xf32, #tpu.memory_space<vmem>>, %arg3: memref<1x128xf32, #tpu.memory_space<vmem>>, %arg4: memref<2x128x128xf32, #tpu.memory_space<vmem>>, %arg5: memref<2x1x128xf32, #tpu.memory_space<vmem>>, %arg6: memref<128x128xf32, #tpu.memory_space<vmem>>, %arg7: memref<1x128xf32, #tpu.memory_space<vmem>>, %arg8: memref<8x128xf32, #tpu.memory_space<vmem>>) attributes {dimension_semantics = [#tpu.dimension_semantics<parallel>], iteration_bounds = array<i64: 2>, scalar_prefetch = 0 : i64, scratch_operands = 0 : i64, tpu.core_type = #tpu.core_type<tc>, window_params = [{transform_indices = @transform_0, window_bounds = array<i64: 8, 128>}, {pipeline_mode = #tpu.pipeline_mode<synchronous>, transform_indices = @transform_1, window_bounds = array<i64: 128, 128>}, {pipeline_mode = #tpu.pipeline_mode<synchronous>, transform_indices = @transform_2, window_bounds = array<i64: 1, 128>}, {pipeline_mode = #tpu.pipeline_mode<synchronous>, transform_indices = @transform_3, window_bounds = array<i64: 2, 128, 128>}, {pipeline_mode = #tpu.pipeline_mode<synchronous>, transform_indices = @transform_4, window_bounds = array<i64: 2, 1, 128>}, {pipeline_mode = #tpu.pipeline_mode<synchronous>, transform_indices = @transform_5, window_bounds = array<i64: 128, 128>}, {pipeline_mode = #tpu.pipeline_mode<synchronous>, transform_indices = @transform_6, window_bounds = array<i64: 1, 128>}, {transform_indices = @transform_7, window_bounds = array<i64: 8, 128>}]} {
    %c0 = arith.constant 0 : index
    %c0_0 = arith.constant 0 : index
    %0 = vector.load %arg1[%c0, %c0_0] : memref<8x128xf32, #tpu.memory_space<vmem>>, vector<8x128xf32>
    %c0_1 = arith.constant 0 : index
    %c0_2 = arith.constant 0 : index
    %1 = vector.load %arg2[%c0_1, %c0_2] : memref<128x128xf32, #tpu.memory_space<vmem>>, vector<128x128xf32>
    %cst = arith.constant dense<0.000000e+00> : vector<8x128xf32>
    %2 = tpu.matmul %0, %1, %cst {dimension_numbers = #tpu.dot_dimension_numbers<[1], [0], [0], [1], [0, 0, 1, 1], [], []>} : vector<8x128xf32>, vector<128x128xf32>, vector<8x128xf32> -> vector<8x128xf32>
    %c0_3 = arith.constant 0 : index
    %c0_4 = arith.constant 0 : index
    %3 = vector.load %arg3[%c0_3, %c0_4] : memref<1x128xf32, #tpu.memory_space<vmem>>, vector<1x128xf32>
    %4 = vector.broadcast %3 : vector<1x128xf32> to vector<8x128xf32>
    %5 = arith.addf %2, %4 : vector<8x128xf32>
    %cst_5 = arith.constant 0.000000e+00 : f32
    %6 = vector.broadcast %cst_5 : f32 to vector<8x128xf32>
    %7 = arith.maximumf %5, %6 : vector<8x128xf32>
    %c0_6 = arith.constant 0 : index
    %c0_7 = arith.constant 0 : index
    %c0_8 = arith.constant 0 : index
    %8 = vector.load %arg4[%c0_6, %c0_7, %c0_8] : memref<2x128x128xf32, #tpu.memory_space<vmem>>, vector<1x128x128xf32>
    %9 = vector.shape_cast %8 : vector<1x128x128xf32> to vector<128x128xf32>
    %c0_9 = arith.constant 0 : index
    %c0_10 = arith.constant 0 : index
    %c0_11 = arith.constant 0 : index
    %10 = vector.load %arg5[%c0_9, %c0_10, %c0_11] : memref<2x1x128xf32, #tpu.memory_space<vmem>>, vector<1x1x128xf32>
    %11 = vector.shape_cast %10 : vector<1x1x128xf32> to vector<1x128xf32>
    %cst_12 = arith.constant dense<0.000000e+00> : vector<8x128xf32>
    %12 = tpu.matmul %7, %9, %cst_12 {dimension_numbers = #tpu.dot_dimension_numbers<[1], [0], [0], [1], [0, 0, 1, 1], [], []>} : vector<8x128xf32>, vector<128x128xf32>, vector<8x128xf32> -> vector<8x128xf32>
    %13 = vector.broadcast %11 : vector<1x128xf32> to vector<8x128xf32>
    %14 = arith.addf %12, %13 : vector<8x128xf32>
    %cst_13 = arith.constant 0.000000e+00 : f32
    %15 = vector.broadcast %cst_13 : f32 to vector<8x128xf32>
    %16 = arith.maximumf %14, %15 : vector<8x128xf32>
    %c1 = arith.constant 1 : index
    %c0_14 = arith.constant 0 : index
    %c0_15 = arith.constant 0 : index
    %17 = vector.load %arg4[%c1, %c0_14, %c0_15] : memref<2x128x128xf32, #tpu.memory_space<vmem>>, vector<1x128x128xf32>
    %18 = vector.shape_cast %17 : vector<1x128x128xf32> to vector<128x128xf32>
    %c1_16 = arith.constant 1 : index
    %c0_17 = arith.constant 0 : index
    %c0_18 = arith.constant 0 : index
    %19 = vector.load %arg5[%c1_16, %c0_17, %c0_18] : memref<2x1x128xf32, #tpu.memory_space<vmem>>, vector<1x1x128xf32>
    %20 = vector.shape_cast %19 : vector<1x1x128xf32> to vector<1x128xf32>
    %cst_19 = arith.constant dense<0.000000e+00> : vector<8x128xf32>
    %21 = tpu.matmul %16, %18, %cst_19 {dimension_numbers = #tpu.dot_dimension_numbers<[1], [0], [0], [1], [0, 0, 1, 1], [], []>} : vector<8x128xf32>, vector<128x128xf32>, vector<8x128xf32> -> vector<8x128xf32>
    %22 = vector.broadcast %20 : vector<1x128xf32> to vector<8x128xf32>
    %23 = arith.addf %21, %22 : vector<8x128xf32>
    %cst_20 = arith.constant 0.000000e+00 : f32
    %24 = vector.broadcast %cst_20 : f32 to vector<8x128xf32>
    %25 = arith.maximumf %23, %24 : vector<8x128xf32>
    %c0_21 = arith.constant 0 : index
    %c0_22 = arith.constant 0 : index
    %26 = vector.load %arg6[%c0_21, %c0_22] : memref<128x128xf32, #tpu.memory_space<vmem>>, vector<128x128xf32>
    %cst_23 = arith.constant dense<0.000000e+00> : vector<8x128xf32>
    %27 = tpu.matmul %25, %26, %cst_23 {dimension_numbers = #tpu.dot_dimension_numbers<[1], [0], [0], [1], [0, 0, 1, 1], [], []>} : vector<8x128xf32>, vector<128x128xf32>, vector<8x128xf32> -> vector<8x128xf32>
    %c0_24 = arith.constant 0 : index
    %c0_25 = arith.constant 0 : index
    %28 = vector.load %arg7[%c0_24, %c0_25] : memref<1x128xf32, #tpu.memory_space<vmem>>, vector<1x128xf32>
    %29 = vector.broadcast %28 : vector<1x128xf32> to vector<8x128xf32>
    %30 = arith.addf %27, %29 : vector<8x128xf32>
    %c0_26 = arith.constant 0 : index
    %c0_27 = arith.constant 0 : index
    %31 = vector.load %arg8[%c0_26, %c0_27] : memref<8x128xf32, #tpu.memory_space<vmem>>, vector<8x128xf32>
    tpu.vector_store %arg8[%c0_26, %c0_27], %30 {strides = array<i32>} : memref<8x128xf32, #tpu.memory_space<vmem>>, vector<8x128xf32>,
    return
  }
  func.func @transform_0(%arg0: i32) -> (i32, i32) {
    %c0_i32 = arith.constant 0 : i32
    %c0_i32_0 = arith.constant 0 : i32
    return %arg0, %c0_i32 : i32, i32
  }
  func.func @transform_1(%arg0: i32) -> (i32, i32) {
    %c0_i32 = arith.constant 0 : i32
    %c0_i32_0 = arith.constant 0 : i32
    %c0_i32_1 = arith.constant 0 : i32
    return %c0_i32, %c0_i32_0 : i32, i32
  }
  func.func @transform_2(%arg0: i32) -> (i32, i32) {
    %c0_i32 = arith.constant 0 : i32
    %c0_i32_0 = arith.constant 0 : i32
    %c0_i32_1 = arith.constant 0 : i32
    return %c0_i32, %c0_i32_0 : i32, i32
  }
  func.func @transform_3(%arg0: i32) -> (i32, i32, i32) {
    %c0_i32 = arith.constant 0 : i32
    %c0_i32_0 = arith.constant 0 : i32
    %c0_i32_1 = arith.constant 0 : i32
    %c0_i32_2 = arith.constant 0 : i32
    return %c0_i32, %c0_i32_0, %c0_i32_1 : i32, i32, i32
  }
  func.func @transform_4(%arg0: i32) -> (i32, i32, i32) {
    %c0_i32 = arith.constant 0 : i32
    %c0_i32_0 = arith.constant 0 : i32
    %c0_i32_1 = arith.constant 0 : i32
    %c0_i32_2 = arith.constant 0 : i32
    return %c0_i32, %c0_i32_0, %c0_i32_1 : i32, i32, i32
  }
  func.func @transform_5(%arg0: i32) -> (i32, i32) {
    %c0_i32 = arith.constant 0 : i32
    %c0_i32_0 = arith.constant 0 : i32
    %c0_i32_1 = arith.constant 0 : i32
    return %c0_i32, %c0_i32_0 : i32, i32
  }
  func.func @transform_6(%arg0: i32) -> (i32, i32) {
    %c0_i32 = arith.constant 0 : i32
    %c0_i32_0 = arith.constant 0 : i32
    %c0_i32_1 = arith.constant 0 : i32
    return %c0_i32, %c0_i32_0 : i32, i32
  }
  func.func @transform_7(%arg0: i32) -> (i32, i32) {
    %c0_i32 = arith.constant 0 : i32
    %c0_i32_0 = arith.constant 0 : i32
    return %arg0, %c0_i32 : i32, i32
  }
}

</mosaic_0001>

<bundles_post_ra>
// kernel: tpu_custom_call.1
= control target key start
LH: loop header
LB: loop body
LE: loop exit
PB: predicated region body
PF: predicated region fallthrough
CT: control target
= control target key end

     0   :  { %12 = vsyncpa [#allocation3], 0  ;;  %s1801_s0 = inlined_call_operand.hbm [shape: f32[16,128], index: 0, kind: input, shape index: {}]   ;;  %s1802_s1 = inlined_call_operand.hbm [shape: f32[128,128], index: 1, kind: input, shape index: {}]   ;;  %s1803_s2 = inlined_call_operand.vmem [shape: f32[1,128], index: 2, kind: input, shape index: {}]   ;;  %s1804_s3 = inlined_call_operand.hbm [shape: f32[2,128,128], index: 3, kind: input, shape index: {}]   ;;  %s1805_s4 = inlined_call_operand.vmem [shape: f32[2,1,128], index: 4, kind: input, shape index: {}]   ;;  %s1806_s5 = inlined_call_operand.hbm [shape: f32[128,128], index: 5, kind: input, shape index: {}]   ;;  %s1807_s6 = inlined_call_operand.vmem [shape: f32[1,128], index: 6, kind: input, shape index: {}]   ;;  %s1808_s7 = inlined_call_operand.hbm [shape: f32[16,128], index: 7, kind: output, shape index: {}]  }
   0x1   :  { %14 = vsyncpa [#allocation3 + $0x1], 0 }
   0x2   :  { %15 = vsyncpa [#allocation6], 0 }
   0x3   :  { %16 = vsyncpa [#allocation9], 0 }
   0x4   :  { %17 = vsyncpa [#allocation4], 0 }
   0x5   :  { %19 = vsyncpa [#allocation4 + $0x1], 0  ;;  %s1479_s24 = smov 0   ;;  %s1481_s25 = smov 0  }
   0x6   :  { %s1483_s26 = smov 0   ;;  %s1485_s27 = smov 0  }
   0x7 LB: > { %s1500_s28 = sadd.s32 4294967295, %s1427_s27   ;;  %s830_s29 = sadd.s32 4294967294, %s1427_s27   ;;  %s1427_s27 = sphi %s1485_s27, %s1834_s27   ;;  %s1423_s26 = sphi %s1483_s26, %s1833_s26   ;;  %s1419_s25 = sphi %s1481_s25, %s1832_s25   ;;  %s1415_s24 = sphi %s1479_s24, %s1831_s24  }
   0x8   : > { %p45_p0 = scmp.ne.s32.totalorder %s1419_s25, %s1415_s24  ;;  %p1809_p1 = scmp.eq.s32.totalorder %s1500_s28, 0 }
   0x9   : > { %p201_p3 = scmp.eq.s32.totalorder %s830_s29, 1  ;;  %p831_p5 = scmp.ge.s32.totalorder %s1427_s27, 1 }
   0xa   : > { %p1509_p4 = por %p1809_p1, %p45_p0  ;;  %p208_p7 = scmp.lt.s32.totalorder %s1427_s27, 3 }
   0xb   : > { %p1514_p6 = por %p201_p3, %p45_p0  ;;  %s1429_s10 = smov [#allocation5]  }
   0xc   : > { %s1813_s30 = scalar_select %p1509_p4, 1, 0 }
   0xd   : > { %s1814_s8 = scalar_select %p1514_p6, 1, 0 }
   0xe   : > { %p1519_p8 = pnand %p831_p5, %p208_p7  ;;  %s220_s11 = sshll.u32 %s1429_s10, 4  ;;  %s1523_s11 = int_to_ptr.vmem [resolvable:$true] %s220_s11 }
   0xf   : > { %1815 = sst [smem:[#allocation15_spill]] %s1814_s8  ;;  %s1430_s13 = smov [#allocation7]  }
  0x10   : > { %s1816_s9 = scalar_select %p1519_p8, 1, 0 }
  0x11   : > { %p1173_p9 = pneg %p1519_p8  ;;  %s236_s14 = sshll.u32 %s1430_s13, 4  ;;  %s1534_s14 = int_to_ptr.vmem [resolvable:$true] %s236_s14 }
  0x12   : > { %s1431_s15 = smov [#allocation8]   ;;  %s1239_s19 = scalar_lea.hbm %s1802_s1, 2048 }
  0x13   : > { %p1530_p11 = pnand %p1173_p9, %p1809_p1  ;;  %s1536_s16 = sshll.u32 %s1431_s15, 4  ;;  %s253_s16 = int_to_ptr.vmem [resolvable:$true] %s1536_s16 }
  0x14   : > { %p1240_p12 = scmp.ne.s32.totalorder %s1802_s1, %s1239_s19  ;;  %p1246_p5 = scmp.lt.u32.totalorder %s1239_s19, %s1802_s1 }
  0x15   : > { %p1546_p13 = pneg %p1530_p11 }
  0x17   : > { %p1242_p0 = pnand %p1546_p13, %p1240_p12 }
  0x19   : > { %p1243_p3 = pneg %p1242_p0 }
  0x1b   : > { %p1248_p7 = pnand %p1246_p5, %p1243_p3 }
  0x1d   : > { %1251 = shalt.err (!%p1248_p7)
}
  0x1e   : > { %s1252_s10 = scalar_lea.vmem %s1523_s11, 2048  ;;  %p1260_p2 = scmp.lt.s32.totalorder %s1523_s11, %s1523_s11 }
  0x1f   : > { %p1253_p9 = scmp.ne.s32.totalorder %s1523_s11, %s1252_s10  ;;  %p1261_p6 = scmp.lt.s32.totalorder %s1252_s10, %s1252_s10 }
  0x21   : > { %p1255_p10 = pnand %p1253_p9, %p1546_p13  ;;  %p1262_p12 = por %p1261_p6, %p1260_p2 }
  0x23   : > { %p1256_p1 = pneg %p1255_p10 }
  0x25   : > { %p1263_p0 = pnand %p1262_p12, %p1256_p1 }
  0x27   : > { %1266 = shalt.err (!%p1263_p0)
}
  0x28   : > { %s1432_s13 = smov 128   ;;  %s1433_s15 = smov 8  }
  0x29   : > { %1176 = dma.hbm_to_vmem [thread:$0]  (!%p1530_p11), %s1802_s1, 2048, %s1523_s11, [#allocation6], %s1432_s13, %s1432_s13, %s1433_s15  }
  0x2a   : > { %s1267_s21 = scalar_lea.hbm %s1804_s3, 4096 }
  0x2b   : > { %p1268_p1 = scmp.ne.s32.totalorder %s1804_s3, %s1267_s21  ;;  %p1274_p10 = scmp.lt.u32.totalorder %s1267_s21, %s1804_s3 }
  0x2d   : > { %p1270_p2 = pnand %p1268_p1, %p1546_p13 }
  0x2f   : > { %p1271_p6 = pneg %p1270_p2 }
  0x31   : > { %p1276_p3 = pnand %p1274_p10, %p1271_p6 }
  0x33   : > { %1279 = shalt.err (!%p1276_p3)
}
  0x34   : > { %s1280_s11 = scalar_lea.vmem %s1534_s14, 4096  ;;  %p1288_p12 = scmp.lt.s32.totalorder %s1534_s14, %s1534_s14 }
  0x35   : > { %p1281_p5 = scmp.ne.s32.totalorder %s1534_s14, %s1280_s11  ;;  %p1289_p0 = scmp.lt.s32.totalorder %s1280_s11, %s1280_s11 }
  0x37   : > { %p1283_p7 = pnand %p1281_p5, %p1546_p13  ;;  %p1290_p1 = por %p1289_p0, %p1288_p12 }
  0x39   : > { %p1284_p9 = pneg %p1283_p7 }
  0x3b   : > { %p1291_p2 = pnand %p1290_p1, %p1284_p9 }
  0x3d   : > { %1294 = shalt.err (!%p1291_p2)
}
  0x3e   : > { %1179 = dma.hbm_to_vmem [thread:$0]  (!%p1530_p11), %s1804_s3, 4096, %s1534_s14, [#allocation6], %s1432_s13, %s1432_s13, %s1433_s15  }
  0x3f   : > { %s1295_s20 = scalar_lea.hbm %s1806_s5, 2048 }
  0x40   : > { %p1296_p6 = scmp.ne.s32.totalorder %s1806_s5, %s1295_s20  ;;  %p1302_p5 = scmp.lt.u32.totalorder %s1295_s20, %s1806_s5 }
  0x42   : > { %p1298_p10 = pnand %p1296_p6, %p1546_p13 }
  0x44   : > { %p1299_p3 = pneg %p1298_p10 }
  0x46   : > { %p1304_p7 = pnand %p1302_p5, %p1299_p3 }
  0x48   : > { %1307 = shalt.err (!%p1304_p7)
}
  0x49   : > { %s1308_s11 = scalar_lea.vmem %s253_s16, 2048  ;;  %p1316_p1 = scmp.lt.s32.totalorder %s253_s16, %s253_s16 }
  0x4a   : > { %p1309_p9 = scmp.ne.s32.totalorder %s253_s16, %s1308_s11  ;;  %p1317_p2 = scmp.lt.s32.totalorder %s1308_s11, %s1308_s11 }
  0x4c   : > { %p1311_p12 = pnand %p1309_p9, %p1546_p13  ;;  %p1318_p4 = por %p1317_p2, %p1316_p1 }
  0x4e   : > { %p1312_p0 = pneg %p1311_p12 }
  0x50   : > { %p1319_p8 = pnand %p1318_p4, %p1312_p0 }
  0x52   : > { %1322 = shalt.err (!%p1319_p8)
}
  0x53   : > { %1182 = dma.hbm_to_vmem [thread:$0]  (!%p1530_p11), %s1806_s5, 2048, %s253_s16, [#allocation9], %s1432_s13, %s1432_s13, %s1433_s15  }
  0x54   : > { %s1619_s22 = sadd.s32 1, %s1427_s27   ;;  %s32_s17 = sadd.s32 1, %s1423_s26 }
  0x55   : > { %s29_s12 = ssub.s32 %s1427_s27, %s1619_s22  ;;  %p39_p8 = scmp.ne.s32.totalorder %s1423_s26, %s1419_s25 }
  0x56   : > { %p30_p4 = scmp.eq.s32.totalorder %s29_s12, 0  ;;  %p40_p13 = scmp.eq.s32.totalorder %s1427_s27, 0 }
  0x57   : > { %p1194_p6 = scmp.lt.s32.totalorder %s1427_s27, 2  ;;  %p1819_p3 = scmp.eq.s32.totalorder %s1500_s28, 1 }
  0x58   : > { %s1629_s18 = scalar_select %p30_p4, %s1423_s26, %s32_s17  }
  0x59   : > { %p41_p10 = por %p40_p13, %p39_p8  ;;  %p1633_p5 = por %p1819_p3, %p39_p8 }
  0x5a   : > { %s269_s20 = sand.u32 1, %s1423_s26   ;;  %s837_s21 = sshll.u32 %s1427_s27, 7 }
  0x5b   : > { %s836_s16 = sshll.u32 %s269_s20, 3  ;;  %s1642_s23 = scalar_lea.hbm %s1801_s0, %s837_s21 }
  0x5c   : > { %s273_s29 = scalar_lea.vmem [#allocation2], %s836_s16  ;;  %p1644_p11 = pnand %p1194_p6, %p41_p10 }
  0x5d   : > { %s280_s10 = sshll.u32 %s273_s29, 4  ;;  %s270_s14 = scalar_lea.sflag [#allocation3], %s269_s20  ;;  %s1648_s10 = int_to_ptr.vmem [resolvable:$true] %s280_s10 }
  0x5e   : > { %s1323_s8 = scalar_lea.hbm %s1642_s23, 128  ;;  %p1325_p9 = pneg %p1644_p11 }
  0x5f   : > { %p1324_p7 = scmp.ne.s32.totalorder %s1642_s23, %s1323_s8  ;;  %s1328_s21 = scalar_lea.hbm %s1801_s0, 256 }
  0x60   : > { %p1329_p1 = scmp.lt.u32.totalorder %s1642_s23, %s1801_s0  ;;  %p1330_p2 = scmp.lt.u32.totalorder %s1328_s21, %s1323_s8 }
  0x61   : > { %p1326_p12 = pnand %p1325_p9, %p1324_p7  ;;  %p1332_p8 = scmp.lt.u32.totalorder %s1323_s8, %s1642_s23 }
  0x62   : > { %p1331_p4 = por %p1330_p2, %p1329_p1 }
  0x63   : > { %p1327_p0 = pneg %p1326_p12 }
  0x64   : > { %p1333_p13 = por %p1332_p8, %p1331_p4 }
  0x66   : > { %p1334_p6 = pnand %p1333_p13, %p1327_p0 }
  0x68   : > { %1337 = shalt.err (!%p1334_p6)
}
  0x69   : > { %s1338_s20 = scalar_lea.vmem %s1648_s10, 128  ;;  %s1434_s15 = smov [#allocation2]  }
  0x6a   : > { %p1339_p10 = scmp.ne.s32.totalorder %s1648_s10, %s1338_s20  ;;  %s1343_s29 = sshll.u32 %s1434_s15, 4  ;;  %s1344_s29 = int_to_ptr.vmem [resolvable:$false] %s1343_s29 }
  0x6b   : > { %s1345_s12 = scalar_lea.vmem %s1344_s29, 256  ;;  %p1346_p12 = scmp.lt.s32.totalorder %s1648_s10, %s1344_s29 }
  0x6c   : > { %p1341_p3 = pnand %p1339_p10, %p1325_p9  ;;  %p1347_p1 = scmp.lt.s32.totalorder %s1345_s12, %s1338_s20 }
  0x6e   : > { %p1342_p7 = pneg %p1341_p3  ;;  %p1348_p2 = por %p1347_p1, %p1346_p12 }
  0x70   : > { %p1349_p4 = pnand %p1348_p2, %p1342_p7 }
  0x72   : > { %1352 = shalt.err (!%p1349_p4)
}
  0x73   : > { %1186 = dma.hbm_to_vmem [thread:$0]  (!%p1644_p11), %s1642_s23, 128, %s1648_s10, %s270_s14  }
  0x74   : > { %p1822_p0 = scmp.ne.s32.totalorder %s1816_s9, 0 }
  0x75   : > { %s1678_s8 = sand.u32 (!%p1822_p0), 1, %s1419_s25   ;;  %p1823_p9 = scmp.ne.s32.totalorder (!%p1822_p0), %s1813_s30, 0 }
  0x76   : > { %289 = sbr.rel (%p1822_p0) target bundleno = 1044 (0x414), region = 48  ;;  %s839_s17 = sshll.u32 (!%p1822_p0), %s1678_s8, 3 }
  0x77   : > { %s292_s21 = scalar_lea.sflag (!%p1822_p0), [#allocation3], %s1678_s8  ;;  %s1684_s16 = scalar_lea.vmem (!%p1822_p0), [#allocation2], %s839_s17 }
  0x7d   : > { %1398 = dma.done.wait (%p1823_p9), %s292_s21, 128  }
  0x7e   : > { %1400 = vsyncadd (%p1823_p9), %s292_s21, 4294967168  ;;  %p1824_p11 = scmp.eq.s32.totalorder %s1500_s28, 0 }
  0x80   : > { %1402 = dma.done.wait (%p1824_p11), [#allocation6], 6144   ;;  %p1825_p8 = pmov %p1824_p11 }
  0x82   : > { %1404 = vsyncadd (%p1825_p8), [#allocation6], 4294961152  ;;  %p1826_p13 = pmov %p1825_p8 }
  0x83   : > { %p1827_p6 = pmov %p1825_p8 }
  0x84   : > { %1406 = dma.done.wait (%p1826_p13), [#allocation9], 2048  }
  0x85   : > { %1408 = vsyncadd (%p1827_p6), [#allocation9], 4294965248  ;;  %v1435_v0 = vmov 0.0|0.0   ;;  %vm1436_vm0 = vmmov 0   ;;  %v1437_v1 = vmov 0.0   ;;  %v339_v2 = vld [vmem:[#allocation5] sm:$0xff] }
  0x86   : > { %1061 = vmatprep.subr.bf16.mxu0 %v1435_v0  ;;  %953 = vmatprep.mubr.msk.f32.mxu0 %vm1436_vm0, %v1437_v1  ;;  %v340_v3 = vld [vmem:[#allocation5 + $0x8] sm:$0xff]  ;;  %v341_v4 = vld [vmem:[#allocation5 + $0x10] sm:$0xff]  ;;  %v342_v6 = vld [vmem:[#allocation5 + $0x18] sm:$0xff]  ;;  %s850_s15 = sshll.u32 %s1500_s28, 7  ;;  %s337_s29 = scalar_lea.vmem [#allocation10], %s839_s17 }
  0x87   : > { %1085 = vmatprep.subr.bf16.mxu1 %v1435_v0  ;;  %988 = vmatprep.mubr.msk.f32.mxu1 %vm1436_vm0, %v1437_v1  ;;  %v1062_v5 = vpack.c.bf16 %v340_v3, %v339_v2  ;;  %v1065_v7 = vpack.c.bf16 %v342_v6, %v341_v4  ;;  %v343_v8 = vld [vmem:[#allocation5 + $0x20] sm:$0xff]  ;;  %v344_v9 = vld [vmem:[#allocation5 + $0x28] sm:$0xff]  ;;  %v435_v12 = vld [vmem:[#allocation7 + $0x10] sm:$0xff]  ;;  %s731_s12 = sshll.u32 %s337_s29, 4  ;;  %s1757_s30 = scalar_lea.hbm %s1808_s7, %s850_s15  ;;  %s1759_s12 = int_to_ptr.vmem [resolvable:$true] %s731_s12 }
  0x88   : > { %v433_v10 = vld [vmem:[#allocation7] sm:$0xff]  ;;  %v434_v11 = vld [vmem:[#allocation7 + $0x8] sm:$0xff]  ;;  %v436_v13 = vld [vmem:[#allocation7 + $0x18] sm:$0xff]  ;;  %v1068_v14 = vpack.c.bf16 %v344_v9, %v343_v8  ;;  %s718_s9 = scalar_lea.sflag [#allocation4], %s1678_s8  ;;  %s1353_s23 = scalar_lea.vmem %s1759_s12, 128 }
  0x89   : > { %1063 = vmatpush3.bf16.msra.mxu0 %v1062_v5  ;;  %v1086_v15 = vpack.c.bf16 %v434_v11, %v433_v10  ;;  %v345_v16 = vld [vmem:[#allocation5 + $0x30] sm:$0xff]  ;;  %v346_v17 = vld [vmem:[#allocation5 + $0x38] sm:$0xff]  ;;  %v1089_v18 = vpack.c.bf16 %v436_v13, %v435_v12  ;;  %v437_v19 = vld [vmem:[#allocation7 + $0x20] sm:$0xff]  ;;  %p1354_p10 = scmp.ne.s32.totalorder %s1759_s12, %s1353_s23  ;;  %s1438_s28 = smov [#allocation10]  }
  0x8a   : > { %1064 = vmatprep.subr.bf16.mxu0 %v1435_v0  ;;  %v438_v20 = vld [vmem:[#allocation7 + $0x28] sm:$0xff]  ;;  %v1071_v21 = vpack.c.bf16 %v346_v17, %v345_v16  ;;  %v347_v22 = vld [vmem:[#allocation5 + $0x40] sm:$0xff]  ;;  %v439_v25 = vld [vmem:[#allocation7 + $0x30] sm:$0xff]  ;;  %s1357_s17 = sshll.u32 %s1438_s28, 4  ;;  %s1358_s17 = int_to_ptr.vmem [resolvable:$false] %s1357_s17 }
  0x8b   : > { %1087 = vmatpush3.bf16.msra.mxu1 %v1086_v15  ;;  %v348_v23 = vld [vmem:[#allocation5 + $0x48] sm:$0xff]  ;;  %v1092_v24 = vpack.c.bf16 %v438_v20, %v437_v19  ;;  %v440_v26 = vld [vmem:[#allocation7 + $0x38] sm:$0xff]  ;;  %v349_v28 = vld [vmem:[#allocation5 + $0x50] sm:$0xff]  ;;  %p1355_p3 = pnand %p1354_p10, %p1633_p5  ;;  %s1359_s10 = scalar_lea.vmem %s1358_s17, 256 }
  0x8c   : > { %1088 = vmatprep.subr.bf16.mxu1 %v1435_v0  ;;  %v1074_v27 = vpack.c.bf16 %v348_v23, %v347_v22  ;;  %v350_v29 = vld [vmem:[#allocation5 + $0x58] sm:$0xff]  ;;  %v1095_v30 = vpack.c.bf16 %v440_v26, %v439_v25  ;;  %v441_v31 = vld [vmem:[#allocation7 + $0x40] sm:$0xff]  ;;  %v442_v32 = vld [vmem:[#allocation7 + $0x48] sm:$0xff]  ;;  %p1360_p12 = scmp.lt.s32.totalorder %s1759_s12, %s1358_s17  ;;  %p1361_p1 = scmp.lt.s32.totalorder %s1359_s10, %s1353_s23 }
  0x8d   : > { %1066 = vmatpush3.bf16.msra.mxu0 %v1065_v7  ;;  %v1077_v33 = vpack.c.bf16 %v350_v29, %v349_v28  ;;  %v351_v34 = vld [vmem:[#allocation5 + $0x60] sm:$0xff]  ;;  %v352_v35 = vld [vmem:[#allocation5 + $0x68] sm:$0xff]  ;;  %v1098_v36 = vpack.c.bf16 %v442_v32, %v441_v31  ;;  %v443_v37 = vld [vmem:[#allocation7 + $0x50] sm:$0xff]  ;;  %p1356_p7 = pneg %p1355_p3 }
  0x8e   : > { %1067 = vmatprep.subr.bf16.mxu0 %v1435_v0  ;;  %v444_v38 = vld [vmem:[#allocation7 + $0x58] sm:$0xff]  ;;  %v1080_v39 = vpack.c.bf16 %v352_v35, %v351_v34  ;;  %v353_v40 = vld [vmem:[#allocation5 + $0x70] sm:$0xff]  ;;  %v445_v43 = vld [vmem:[#allocation7 + $0x60] sm:$0xff]  ;;  %p1362_p2 = por %p1361_p1, %p1360_p12 }
  0x8f   : > { %1090 = vmatpush3.bf16.msra.mxu1 %v1089_v18  ;;  %v354_v41 = vld [vmem:[#allocation5 + $0x78] sm:$0xff]  ;;  %v1101_v42 = vpack.c.bf16 %v444_v38, %v443_v37  ;;  %v446_v44 = vld [vmem:[#allocation7 + $0x68] sm:$0xff]  ;;  %v447_v48 = vld [vmem:[#allocation7 + $0x70] sm:$0xff] }
  0x90   : > { %1091 = vmatprep.subr.bf16.mxu1 %v1435_v0  ;;  %v1083_v45 = vpack.c.bf16 %v354_v41, %v353_v40  ;;  %v1104_v46 = vpack.c.bf16 %v446_v44, %v445_v43  ;;  %v338_v47 = vld [vmem:[%s1684_s16] sm:$0xff]  ;;  %v528_v51 = vld [vmem:[#allocation7 + $0x80] sm:$0xff]  ;;  %v529_v52 = vld [vmem:[#allocation7 + $0x88] sm:$0xff]  ;;  %p1363_p4 = pnand %p1362_p2, %p1356_p7 }
  0x91   : > { %1069 = vmatpush3.bf16.msra.mxu0 %v1068_v14  ;;  %v448_v49 = vld [vmem:[#allocation7 + $0x78] sm:$0xff]  ;;  %v530_v53 = vld [vmem:[#allocation7 + $0x90] sm:$0xff]  ;;  %v1110_v54 = vpack.c.bf16 %v529_v52, %v528_v51  ;;  %v532_v57 = vld [vmem:[#allocation7 + $0xa0] sm:$0xff] }
  0x92   : > { %1070 = vmatprep.subr.bf16.mxu0 %v1435_v0  ;;  %v1107_v50 = vpack.c.bf16 %v448_v49, %v447_v48  ;;  %v531_v55 = vld [vmem:[#allocation7 + $0x98] sm:$0xff]  ;;  %v533_v58 = vld [vmem:[#allocation7 + $0xa8] sm:$0xff]  ;;  %v534_v60 = vld [vmem:[#allocation7 + $0xb0] sm:$0xff] }
  0x93   : > { %1093 = vmatpush3.bf16.msra.mxu1 %v1092_v24  ;;  %v1113_v56 = vpack.c.bf16 %v531_v55, %v530_v53  ;;  %v1116_v59 = vpack.c.bf16 %v533_v58, %v532_v57  ;;  %v535_v61 = vld [vmem:[#allocation7 + $0xb8] sm:$0xff]  ;;  %v536_v63 = vld [vmem:[#allocation7 + $0xc0] sm:$0xff]  ;;  %v537_v2 = vld [vmem:[#allocation7 + $0xc8] sm:$0xff] }
  0x94   : > { %1094 = vmatprep.subr.bf16.mxu1 %v1435_v0  ;;  %v1119_v62 = vpack.c.bf16 %v535_v61, %v534_v60  ;;  %v1122_v3 = vpack.c.bf16 %v537_v2, %v536_v63  ;;  %v538_v4 = vld [vmem:[#allocation7 + $0xd0] sm:$0xff]  ;;  %v539_v5 = vld [vmem:[#allocation7 + $0xd8] sm:$0xff]  ;;  %v540_v7 = vld [vmem:[#allocation7 + $0xe0] sm:$0xff] }
  0x95   : > { %1072 = vmatpush3.bf16.msra.mxu0 %v1071_v21  ;;  %v1125_v6 = vpack.c.bf16 %v539_v5, %v538_v4  ;;  %v541_v8 = vld [vmem:[#allocation7 + $0xe8] sm:$0xff]  ;;  %v844_v10 = vld [vmem:[%s1803_s2] ss:$0 sm:$0xff]  ;;  %v543_v16 = vld [vmem:[#allocation7 + $0xf8] sm:$0xff] }
  0x96   : > { %1073 = vmatprep.subr.bf16.mxu0 %v1435_v0  ;;  %v1128_v9 = vpack.c.bf16 %v541_v8, %v540_v7  ;;  %v542_v15 = vld [vmem:[#allocation7 + $0xf0] sm:$0xff]  ;;  %v623_v18 = vld [vmem:[#allocation8] sm:$0xff]  ;;  %v624_v19 = vld [vmem:[#allocation8 + $0x8] sm:$0xff] }
  0x97   : > { %1096 = vmatpush3.bf16.msra.mxu1 %v1095_v30  ;;  %v1131_v17 = vpack.c.bf16 %v543_v16, %v542_v15  ;;  %v625_v20 = vld [vmem:[#allocation8 + $0x10] sm:$0xff]  ;;  %v1134_v21 = vpack.c.bf16 %v624_v19, %v623_v18  ;;  %v626_v22 = vld [vmem:[#allocation8 + $0x18] sm:$0xff]  ;;  %v627_v24 = vld [vmem:[#allocation8 + $0x20] sm:$0xff] }
  0x98   : > { %1097 = vmatprep.subr.bf16.mxu1 %v1435_v0  ;;  %v1137_v23 = vpack.c.bf16 %v626_v22, %v625_v20  ;;  %v628_v25 = vld [vmem:[#allocation8 + $0x28] sm:$0xff]  ;;  %v631_v29 = vld [vmem:[#allocation8 + $0x40] sm:$0xff]  ;;  %v633_v32 = vld [vmem:[#allocation8 + $0x50] sm:$0xff] }
  0x99   : > { %1075 = vmatpush3.bf16.msra.mxu0 %v1074_v27  ;;  %v1140_v26 = vpack.c.bf16 %v628_v25, %v627_v24  ;;  %v630_v27 = vld [vmem:[#allocation8 + $0x38] sm:$0xff]  ;;  %v632_v30 = vld [vmem:[#allocation8 + $0x48] sm:$0xff]  ;;  %v635_v35 = vld [vmem:[#allocation8 + $0x60] sm:$0xff] }
  0x9a   : > { %1076 = vmatprep.subr.bf16.mxu0 %v1435_v0  ;;  %v1146_v31 = vpack.c.bf16 %v632_v30, %v631_v29  ;;  %v845_v38 = vld [vmem:[%s1805_s4] ss:$0 sm:$0xff]  ;;  %v638_v44 = vld [vmem:[#allocation8 + $0x78] sm:$0xff] }
  0x9b   : > { %1099 = vmatpush3.bf16.msra.mxu1 %v1098_v36  ;;  %v636_v36 = vld [vmem:[#allocation8 + $0x68] sm:$0xff]  ;;  %v637_v43 = vld [vmem:[#allocation8 + $0x70] sm:$0xff] }
  0x9c   : > { %1100 = vmatprep.subr.bf16.mxu1 %v1435_v0  ;;  %v1152_v37 = vpack.c.bf16 %v636_v36, %v635_v35 }
  0x9d   : > { %1078 = vmatpush3.bf16.msra.mxu0 %v1077_v33  ;;  %v634_v33 = vld [vmem:[#allocation8 + $0x58] sm:$0xff] }
  0x9e   : > { %1079 = vmatprep.subr.bf16.mxu0 %v1435_v0  ;;  %v1149_v34 = vpack.c.bf16 %v634_v33, %v633_v32 }
  0x9f   : > { %1102 = vmatpush3.bf16.msra.mxu1 %v1101_v42 }
  0xa0   : > { %1103 = vmatprep.subr.bf16.mxu1 %v1435_v0 }
  0xa1   : > { %1081 = vmatpush3.bf16.msra.mxu0 %v1080_v39 }
  0xa2   : > { %1082 = vmatprep.subr.bf16.mxu0 %v1435_v0 }
  0xa3   : > { %1105 = vmatpush3.bf16.msra.mxu1 %v1104_v46  ;;  %v847_v46 = vld [vmem:[%s1805_s4 + $0x1] ss:$0 sm:$0xff] }
  0xa4   : > { %1106 = vmatprep.subr.bf16.mxu1 %v1435_v0 }
  0xa5   : > { %1084 = vmatpush3.bf16.msra.mxu0 %v1083_v45  ;;  %v1155_v45 = vpack.c.bf16 %v638_v44, %v637_v43 }
  0xa6   : > { %1109 = vmatprep.subr.bf16.mxu0 %v1435_v0 }
  0xa7   : > { %1108 = vmatpush3.bf16.msra.mxu1 %v1107_v50  ;;  %v848_v50 = vld [vmem:[%s1807_s6] ss:$0 sm:$0xff] }
  0xa8   : > { %954 = vmatmul.mubr.f32.vlgmr.msra.gmra.mrb[0].mxu0 %v338_v47  ;;  %1133 = vmatprep.subr.bf16.mxu1 %v1435_v0 }
  0xa9   : > { %1023 = vmatprep.mubr.msk.f32.mxu0 %vm1436_vm0, %v1437_v1  ;;  %1111 = vmatpush3.bf16.msra.mxu0 %v1110_v54 }
  0xaa   : > { %1112 = vmatprep.subr.bf16.mxu0 %v1435_v0 }
  0xad   : > { %1114 = vmatpush3.bf16.msra.mxu0 %v1113_v56 }
  0xae   : > { %1115 = vmatprep.subr.bf16.mxu0 %v1435_v0 }
  0xb1   : > { %1117 = vmatpush3.bf16.msra.mxu0 %v1116_v59 }
  0xb2   : > { %1118 = vmatprep.subr.bf16.mxu0 %v1435_v0 }
  0xb5   : > { %1120 = vmatpush3.bf16.msra.mxu0 %v1119_v62 }
  0xb6   : > { %1121 = vmatprep.subr.bf16.mxu0 %v1435_v0 }
  0xb9   : > { %1123 = vmatpush3.bf16.msra.mxu0 %v1122_v3 }
  0xba   : > { %1124 = vmatprep.subr.bf16.mxu0 %v1435_v0 }
  0xbd   : > { %1126 = vmatpush3.bf16.msra.mxu0 %v1125_v6 }
  0xbe   : > { %1127 = vmatprep.subr.bf16.mxu0 %v1435_v0 }
  0xc1   : > { %1129 = vmatpush3.bf16.msra.mxu0 %v1128_v9 }
  0xc2   : > { %1130 = vmatprep.subr.bf16.mxu0 %v1435_v0 }
  0xc5   : > { %1132 = vmatpush3.bf16.msra.mxu0 %v1131_v17 }
 0x17b   : > { %v428_v11 = vpop.f32.mrb[0].mxu0 }
 0x17c   : > { %v429_v12 = vadd.f32 %v844_v10, %v428_v11  ;;  %v955_v13 = vpop.f32.mrb[1].mxu0 }
 0x17e   : > { %v432_v14 = vmax.f32 %v429_v12, 0.0 }
 0x180   : > { %989 = vmatmul.mubr.f32.vlgmr.msra.gmra.mrb[0].mxu1 %v432_v14 }
 0x181   : > { %1058 = vmatprep.mubr.msk.f32.mxu1 %vm1436_vm0, %v1437_v1  ;;  %1135 = vmatpush3.bf16.msra.mxu1 %v1134_v21  ;;  %v629_v1 = vld [vmem:[#allocation8 + $0x30] sm:$0xff] }
 0x182   : > { %1136 = vmatprep.subr.bf16.mxu1 %v1435_v0  ;;  %v1143_v28 = vpack.c.bf16 %v630_v27, %v629_v1 }
 0x185   : > { %1138 = vmatpush3.bf16.msra.mxu1 %v1137_v23 }
 0x186   : > { %1139 = vmatprep.subr.bf16.mxu1 %v1435_v0 }
 0x189   : > { %1141 = vmatpush3.bf16.msra.mxu1 %v1140_v26 }
 0x18a   : > { %1142 = vmatprep.subr.bf16.mxu1 %v1435_v0 }
 0x18d   : > { %1144 = vmatpush3.bf16.msra.mxu1 %v1143_v28 }
 0x18e   : > { %1145 = vmatprep.subr.bf16.mxu1 %v1435_v0 }
 0x191   : > { %1147 = vmatpush3.bf16.msra.mxu1 %v1146_v31 }
 0x192   : > { %1148 = vmatprep.subr.bf16.mxu1 %v1435_v0 }
 0x195   : > { %1150 = vmatpush3.bf16.msra.mxu1 %v1149_v34 }
 0x196   : > { %1151 = vmatprep.subr.bf16.mxu1 %v1435_v0 }
 0x199   : > { %1153 = vmatpush3.bf16.msra.mxu1 %v1152_v37 }
 0x19a   : > { %1154 = vmatprep.subr.bf16.mxu1 %v1435_v0 }
 0x19d   : > { %1156 = vmatpush3.bf16.msra.mxu1 %v1155_v45 }
 0x253   : > { %v522_v39 = vpop.f32.mrb[0].mxu1 }
 0x254   : > { %v523_v40 = vadd.f32 %v845_v38, %v522_v39  ;;  %v990_v41 = vpop.f32.mrb[1].mxu1 }
 0x256   : > { %v526_v42 = vmax.f32 %v523_v40, 0.0 }
 0x258   : > { %1024 = vmatmul.mubr.f32.vlgmr.msra.gmra.mrb[2].mxu0 %v526_v42 }
 0x32b   : > { %v618_v0 = vpop.f32.mrb[2].mxu0 }
 0x32c   : > { %v619_v47 = vadd.f32 %v847_v46, %v618_v0  ;;  %v1025_v48 = vpop.f32.mrb[3].mxu0 }
 0x32e   : > { %v622_v49 = vmax.f32 %v619_v47, 0.0 }
 0x330   : > { %1059 = vmatmul.mubr.f32.vlgmr.msra.gmra.mrb[2].mxu1 %v622_v49 }
 0x403   : > { %v712_v51 = vpop.f32.mrb[2].mxu1 }
 0x404   : > { %v713_v52 = vadd.f32 %v848_v50, %v712_v51  ;;  %v1060_v53 = vpop.f32.mrb[3].mxu1 }
 0x406   : > { %716 = vst [vmem:[%s337_s29] sm:$0xff] %v713_v52 }
 0x407   : > { %1366 = shalt.err (!%p1363_p4)
}
 0x408   : > { %s1367_s8 = scalar_lea.hbm %s1757_s30, 128  ;;  %s1371_s13 = scalar_lea.hbm %s1808_s7, 256 }
 0x409   : > { %p1368_p0 = scmp.ne.s32.totalorder %s1757_s30, %s1367_s8  ;;  %p1372_p8 = scmp.lt.u32.totalorder %s1757_s30, %s1808_s7 }
 0x40a   : > { %p1373_p13 = scmp.lt.u32.totalorder %s1371_s13, %s1367_s8  ;;  %p1375_p10 = scmp.lt.u32.totalorder %s1367_s8, %s1757_s30 }
 0x40b   : > { %p1369_p9 = pnand %p1368_p0, %p1633_p5 }
 0x40c   : > { %p1374_p6 = por %p1373_p13, %p1372_p8 }
 0x40d   : > { %p1370_p11 = pneg %p1369_p9 }
 0x40e   : > { %p1376_p3 = por %p1375_p10, %p1374_p6 }
 0x410   : > { %p1377_p7 = pnand %p1376_p3, %p1370_p11 }
 0x412   : > { %1380 = shalt.err (!%p1377_p7)
}
 0x413   : > { %1171 = dma.vmem_to_hbm [thread:$0]  (%p1633_p5), %s1759_s12, 128, %s1757_s30, %s718_s9  }
 0x414 PF: > { %s1828_s29 = sld [smem:[#allocation15_spill]]  ;;  %s743_s21 = sand.u32 1, %s1415_s24  }
 0x415   : > { %p1830_p1 = scmp.ge.s32.totalorder %s1427_s27, 2  ;;  %s744_s16 = scalar_lea.sflag [#allocation4], %s743_s21 }
 0x41a   : > { %p1829_p12 = scmp.ne.s32.totalorder %s1828_s29, 0 }
 0x41c   : > { %p1188_p2 = pnand %p1830_p1, %p1829_p12 }
 0x41e   : > { %1410 = dma.done.wait (!%p1188_p2), %s744_s16, 128  }
 0x41f   : > { %1412 = vsyncadd (!%p1188_p2), %s744_s16, 4294967168  ;;  %p22_p4 = scmp.ge.s32.totalorder %s1619_s22, 4   ;;  %s1831_s24 = smov %s1419_s25 }
 0x420   : > { %s1832_s25 = smov %s1423_s26  ;;  %s1833_s26 = smov %s1629_s18 }
 0x421   : > { %s1834_s27 = smov %s1619_s22  ;;  %24 = sbr.rel (!%p22_p4) target bundleno = 7 (0x7), region = 107 }
 0x428   :  { %749 = vsyncpa [#allocation3], 1 }
 0x429   :  { %751 = vsyncpa [#allocation3 + $0x1], 1 }
 0x42a   :  { %752 = vsyncpa [#allocation6], 1 }
 0x42b   :  { %753 = vsyncpa [#allocation9], 1 }
 0x42c   :  { %754 = vsyncpa [#allocation4], 1 }
 0x42d   :  { %756 = vsyncpa [#allocation4 + $0x1], 1 }

</bundles_post_ra>
